<compile_context>
chip_gen: v6e
topology: v6e:2x2x1
jax: 0.10.0
libtpu: 0.0.40
codegen_flags: <defaults>
</compile_context>

<pallas_src>
import math

import jax
import jax.numpy as jnp
from jax.experimental import pallas as pl
from jax.experimental.pallas import tpu as pltpu


def _erf(x):
    # Abramowitz & Stegun 7.1.26 rational approximation (|err| < 1.5e-7),
    # built only from ops with guaranteed Mosaic lowerings.
    p = 0.3275911
    a1, a2, a3, a4, a5 = 0.254829592, -0.284496736, 1.421413741, -1.453152027, 1.061405429
    sgn = jnp.where(x >= 0.0, 1.0, -1.0)
    ax = jnp.abs(x)
    # approx reciprocal -> EUP slot (otherwise idle except the single exp).
    t = pl.reciprocal(1.0 + p * ax, approx=True)
    poly = t * (a1 + t * (a2 + t * (a3 + t * (a4 + t * a5))))
    return sgn * (1.0 - poly * jnp.exp(-ax * ax))


def _gelu_exact(x):
    # Matches torch.nn.GELU() default (erf-based, not the tanh approximation).
    return 0.5 * x * (1.0 + _erf(x * 0.7071067811865476))


def _mlp_kernel(x_ref, w1_ref, b1_ref, w2_ref, b2_ref, out_ref):
    # x_ref : (1, C_in, T) f32       w1_ref: (Hd, C_in) bf16   b1_ref: (Hd, 1)  f32
    # w2_ref: (C_out, Hd)  bf16      b2_ref: (C_out, 1) f32    out_ref: (1, C_out, T)
    x = x_ref[0].astype(jnp.bfloat16)                                   # cast in-kernel (free under DMA)
    h = jnp.dot(w1_ref[...], x, preferred_element_type=jnp.float32) + b1_ref[...]
    h = _gelu_exact(h)                                                  # f32 on VPU + EUP
    h = h.astype(jnp.bfloat16)                                          # bf16 for the second MXU push
    y = jnp.dot(w2_ref[...], h, preferred_element_type=jnp.float32) + b2_ref[...]
    out_ref[0] = y.astype(out_ref.dtype)


def _pick_tile_hw(B, HW, C_in, C_out, Hd, out_bytes, vmem_limit):
    """Largest 128-aligned spatial tile that fits the VMEM budget."""
    if HW <= 128:
        return HW  # single full-dim block (block == full array dim is allowed)
    # Per-lane VMEM cost: double-buffered input/output blocks + f32 hidden
    # intermediate (with headroom for GELU temporaries).
    per_lane = 2 * (C_in * 4 + C_out * out_bytes) + 4 * (Hd * 4)
    budget = vmem_limit // 2                 # headroom for weights / compiler scratch
    cap = max(128, (budget // per_lane) // 128 * 128)
    tile = min(cap, (HW // 128) * 128)       # ragged tail (if any) masked by Pallas
    if B == 1:
        # v7x megacore: keep >= 2 grid steps so both TensorCores get work.
        half = max(128, pl.cdiv(pl.cdiv(HW, 2), 128) * 128)
        tile = min(tile, half)
    return tile


def mlp_forward(x, w1, b1, w2, b2, *, out_dtype=jnp.float32, tile_hw=None):
    """x: (B, C_in, H, W) f32.  w1: (Hd, C_in), b1: (Hd,), w2: (C_out, Hd), b2: (C_out,)
    in PyTorch nn.Linear layout.  Returns (B, C_out, H, W) in out_dtype."""
    B, C_in, H, W = x.shape
    Hd, C_in_w = w1.shape
    C_out, Hd2 = w2.shape
    assert C_in == C_in_w and Hd == Hd2
    HW = H * W
    out_bytes = jnp.dtype(out_dtype).itemsize

    # Per-generation VMEM budget (v5e/v6e: 128 MiB physical, v7x: 64 MiB).
    try:
        info = pltpu.get_tpu_info()
        vmem_capacity = int(getattr(info, "vmem_capacity_bytes", 64 * 1024 * 1024))
    except Exception:
        vmem_capacity = 64 * 1024 * 1024            # conservative v7x default
    vmem_limit = max(32 * 1024 * 1024,
                     min(vmem_capacity * 3 // 4, 100 * 1024 * 1024))

    if tile_hw is None:
        tile_hw = _pick_tile_hw(B, HW, C_in, C_out, Hd, out_bytes, vmem_limit)
    else:
        if HW <= 128:
            tile_hw = HW
        else:
            tile_hw = max(128, (min(tile_hw, HW) // 128) * 128)

    # Free contiguous reshape; no pad, no dtype-cast HBM pass for x.
    xf = x.reshape(B, C_in, HW)

    # Weights/biases are tiny; cast once in the wrapper, kept resident in VMEM.
    w1b = w1.astype(jnp.bfloat16)
    w2b = w2.astype(jnp.bfloat16)
    b1c = b1.reshape(Hd, 1).astype(jnp.float32)
    b2c = b2.reshape(C_out, 1).astype(jnp.float32)

    grid = (B, pl.cdiv(HW, tile_hw))
    # NOTE: if HW is genuinely tiny and leaves many KB-scale grid steps,
    # pipeline_mode=pl.Buffered(3) on the x spec could deepen prefetch; big
    # tiles (above) are the first-order fix, so it is omitted here.

    out = pl.pallas_call(
        _mlp_kernel,
        out_shape=jax.ShapeDtypeStruct((B, C_out, HW), out_dtype),
        grid=grid,
        in_specs=[
            pl.BlockSpec((1, C_in, tile_hw), lambda b, j: (b, 0, j)),
            pl.BlockSpec((Hd, C_in), lambda b, j: (0, 0)),     # resident weights
            pl.BlockSpec((Hd, 1), lambda b, j: (0, 0)),        # resident bias
            pl.BlockSpec((C_out, Hd), lambda b, j: (0, 0)),    # resident weights
            pl.BlockSpec((C_out, 1), lambda b, j: (0, 0)),     # resident bias
        ],
        out_specs=pl.BlockSpec((1, C_out, tile_hw), lambda b, j: (b, 0, j)),
        compiler_params=pltpu.CompilerParams(
            dimension_semantics=("parallel", "parallel"),
            vmem_limit_bytes=vmem_limit),
        cost_estimate=pl.CostEstimate(
            flops=2 * B * HW * (C_in * Hd + Hd * C_out),
            transcendentals=B * HW * Hd,
            bytes_accessed=(B * C_in * HW * 4               # f32 input read
                            + Hd * C_in * 2 + C_out * Hd * 2
                            + Hd * 4 + C_out * 4
                            + B * C_out * HW * out_bytes),  # output write
        ),
    )(xf, w1b, b1c, w2b, b2c)

    return out.reshape(B, C_out, H, W)


def _reference(x, w1, b1, w2, b2):
    """Pure-JAX/XLA reference mirroring the PyTorch forward exactly (f32, erf-GELU)."""
    xb = jnp.transpose(x, (0, 2, 3, 1))            # b c h w -> b h w c
    h = xb @ w1.T + b1
    h = jax.nn.gelu(h, approximate=False)          # torch nn.GELU() default
    y = h @ w2.T + b2
    return jnp.transpose(y, (0, 3, 1, 2))          # b h w c -> b c h w


if __name__ == "__main__":
    # Shapes implied by the module: batch=2, in_chans=4, spatial 16x16, hidden=32,
    # output_features defaults to input_features.
    B, C_in, H, W = 2, 4, 16, 16
    hidden = 32
    C_out = C_in

    key = jax.random.PRNGKey(0)
    kx, kw1, kb1, kw2, kb2 = jax.random.split(key, 5)
    x = jax.random.normal(kx, (B, C_in, H, W), dtype=jnp.float32)
    # PyTorch nn.Linear layout: weight (out, in), bias (out,)
    w1 = jax.random.normal(kw1, (hidden, C_in), dtype=jnp.float32) * (1.0 / math.sqrt(C_in))
    b1 = jax.random.normal(kb1, (hidden,), dtype=jnp.float32) * 0.1
    w2 = jax.random.normal(kw2, (C_out, hidden), dtype=jnp.float32) * (1.0 / math.sqrt(hidden))
    b2 = jax.random.normal(kb2, (C_out,), dtype=jnp.float32) * 0.1

    # Make inputs/params exactly representable in bf16 so the f32 reference and
    # the bf16-MXU kernel see identical operands (standard mixed-precision test).
    def q(a):
        return a.astype(jnp.bfloat16).astype(jnp.float32)
    x, w1, b1, w2, b2 = q(x), q(w1), q(b1), q(w2), q(b2)

    out = mlp_forward(x, w1, b1, w2, b2)           # auto tile -> grid (B, 1), both axes parallel
    out = jax.block_until_ready(out)

    ref = _reference(x, w1, b1, w2, b2)
    assert out.shape == (B, C_out, H, W), out.shape
    max_err = float(jnp.max(jnp.abs(out - ref)))
    # bf16 intermediate (hidden activations) + approx erf vs f32 reference.
    assert jnp.allclose(out, ref, atol=2e-2, rtol=2e-2), max_err

    print("KERNEL_OK")
</pallas_src>

<mosaic_0001>
module attributes {stable_mosaic.version = 11 : i64} {
  func.func @_mlp_kernel(%arg0: i32, %arg1: i32, %arg2: memref<1x4x256xf32, #tpu.memory_space<vmem>>, %arg3: memref<32x4xbf16, #tpu.memory_space<vmem>>, %arg4: memref<32x1xf32, #tpu.memory_space<vmem>>, %arg5: memref<4x32xbf16, #tpu.memory_space<vmem>>, %arg6: memref<4x1xf32, #tpu.memory_space<vmem>>, %arg7: memref<1x4x256xf32, #tpu.memory_space<vmem>>) attributes {dimension_semantics = [#tpu.dimension_semantics<parallel>, #tpu.dimension_semantics<parallel>], iteration_bounds = array<i64: 2, 1>, scalar_prefetch = 0 : i64, scratch_operands = 0 : i64, tpu.core_type = #tpu.core_type<tc>, window_params = [{transform_indices = @transform_0, window_bounds = array<i64: 1, 4, 256>}, {pipeline_mode = #tpu.pipeline_mode<synchronous>, transform_indices = @transform_1, window_bounds = array<i64: 32, 4>}, {pipeline_mode = #tpu.pipeline_mode<synchronous>, transform_indices = @transform_2, window_bounds = array<i64: 32, 1>}, {pipeline_mode = #tpu.pipeline_mode<synchronous>, transform_indices = @transform_3, window_bounds = array<i64: 4, 32>}, {pipeline_mode = #tpu.pipeline_mode<synchronous>, transform_indices = @transform_4, window_bounds = array<i64: 4, 1>}, {transform_indices = @transform_5, window_bounds = array<i64: 1, 4, 256>}]} {
    %c0 = arith.constant 0 : index
    %c0_0 = arith.constant 0 : index
    %c0_1 = arith.constant 0 : index
    %0 = vector.load %arg2[%c0, %c0_0, %c0_1] : memref<1x4x256xf32, #tpu.memory_space<vmem>>, vector<1x4x256xf32>
    %1 = vector.shape_cast %0 : vector<1x4x256xf32> to vector<4x256xf32>
    %2 = arith.truncf %1 : vector<4x256xf32> to vector<4x256xbf16>
    %c0_2 = arith.constant 0 : index
    %c0_3 = arith.constant 0 : index
    %3 = vector.load %arg3[%c0_2, %c0_3] : memref<32x4xbf16, #tpu.memory_space<vmem>>, vector<32x4xbf16>
    %cst = arith.constant dense<0.000000e+00> : vector<32x256xf32>
    %4 = tpu.matmul %3, %2, %cst {dimension_numbers = #tpu.dot_dimension_numbers<[1], [0], [0], [1], [0, 0, 1, 1], [], []>} : vector<32x4xbf16>, vector<4x256xbf16>, vector<32x256xf32> -> vector<32x256xf32>
    %c0_4 = arith.constant 0 : index
    %c0_5 = arith.constant 0 : index
    %5 = vector.load %arg4[%c0_4, %c0_5] : memref<32x1xf32, #tpu.memory_space<vmem>>, vector<32x1xf32>
    %6 = vector.broadcast %5 : vector<32x1xf32> to vector<32x256xf32>
    %7 = arith.addf %4, %6 : vector<32x256xf32>
    %cst_6 = arith.constant 5.000000e-01 : f32
    %8 = vector.broadcast %cst_6 : f32 to vector<32x256xf32>
    %9 = arith.mulf %8, %7 : vector<32x256xf32>
    %cst_7 = arith.constant 0.707106769 : f32
    %10 = vector.broadcast %cst_7 : f32 to vector<32x256xf32>
    %11 = arith.mulf %7, %10 : vector<32x256xf32>
    %cst_8 = arith.constant 0.000000e+00 : f32
    %12 = vector.broadcast %cst_8 : f32 to vector<32x256xf32>
    %13 = arith.cmpf oge, %11, %12 : vector<32x256xf32>
    %cst_9 = arith.constant 1.000000e+00 : f32
    %cst_10 = arith.constant -1.000000e+00 : f32
    %14 = vector.broadcast %cst_9 : f32 to vector<32x256xf32>
    %15 = vector.broadcast %cst_10 : f32 to vector<32x256xf32>
    %16 = arith.select %13, %14, %15 : vector<32x256xi1>, vector<32x256xf32>
    %17 = math.absf %11 : vector<32x256xf32>
    %cst_11 = arith.constant 0.327591091 : f32
    %18 = vector.broadcast %cst_11 : f32 to vector<32x256xf32>
    %19 = arith.mulf %18, %17 : vector<32x256xf32>
    %cst_12 = arith.constant 1.000000e+00 : f32
    %20 = vector.broadcast %cst_12 : f32 to vector<32x256xf32>
    %21 = arith.addf %20, %19 : vector<32x256xf32>
    %22 = tpu.reciprocal %21 {approx = true} : vector<32x256xf32> -> vector<32x256xf32>
    %cst_13 = arith.constant 1.06140542 : f32
    %23 = vector.broadcast %cst_13 : f32 to vector<32x256xf32>
    %24 = arith.mulf %22, %23 : vector<32x256xf32>
    %cst_14 = arith.constant -1.45315206 : f32
    %25 = vector.broadcast %cst_14 : f32 to vector<32x256xf32>
    %26 = arith.addf %25, %24 : vector<32x256xf32>
    %27 = arith.mulf %22, %26 : vector<32x256xf32>
    %cst_15 = arith.constant 1.42141378 : f32
    %28 = vector.broadcast %cst_15 : f32 to vector<32x256xf32>
    %29 = arith.addf %28, %27 : vector<32x256xf32>
    %30 = arith.mulf %22, %29 : vector<32x256xf32>
    %cst_16 = arith.constant -0.284496725 : f32
    %31 = vector.broadcast %cst_16 : f32 to vector<32x256xf32>
    %32 = arith.addf %31, %30 : vector<32x256xf32>
    %33 = arith.mulf %22, %32 : vector<32x256xf32>
    %cst_17 = arith.constant 0.254829586 : f32
    %34 = vector.broadcast %cst_17 : f32 to vector<32x256xf32>
    %35 = arith.addf %34, %33 : vector<32x256xf32>
    %36 = arith.mulf %22, %35 : vector<32x256xf32>
    %cst_18 = arith.constant 0.000000e+00 : f32
    %37 = vector.broadcast %cst_18 : f32 to vector<32x256xf32>
    %38 = arith.subf %37, %17 : vector<32x256xf32>
    %39 = arith.mulf %38, %17 : vector<32x256xf32>
    %40 = math.exp %39 : vector<32x256xf32>
    %41 = arith.mulf %36, %40 : vector<32x256xf32>
    %cst_19 = arith.constant 1.000000e+00 : f32
    %42 = vector.broadcast %cst_19 : f32 to vector<32x256xf32>
    %43 = arith.subf %42, %41 : vector<32x256xf32>
    %44 = arith.mulf %16, %43 : vector<32x256xf32>
    %cst_20 = arith.constant 1.000000e+00 : f32
    %45 = vector.broadcast %cst_20 : f32 to vector<32x256xf32>
    %46 = arith.addf %45, %44 : vector<32x256xf32>
    %47 = arith.mulf %9, %46 : vector<32x256xf32>
    %48 = arith.truncf %47 : vector<32x256xf32> to vector<32x256xbf16>
    %c0_21 = arith.constant 0 : index
    %c0_22 = arith.constant 0 : index
    %49 = vector.load %arg5[%c0_21, %c0_22] : memref<4x32xbf16, #tpu.memory_space<vmem>>, vector<4x32xbf16>
    %cst_23 = arith.constant dense<0.000000e+00> : vector<4x256xf32>
    %50 = tpu.matmul %49, %48, %cst_23 {dimension_numbers = #tpu.dot_dimension_numbers<[1], [0], [0], [1], [0, 0, 1, 1], [], []>} : vector<4x32xbf16>, vector<32x256xbf16>, vector<4x256xf32> -> vector<4x256xf32>
    %c0_24 = arith.constant 0 : index
    %c0_25 = arith.constant 0 : index
    %51 = vector.load %arg6[%c0_24, %c0_25] : memref<4x1xf32, #tpu.memory_space<vmem>>, vector<4x1xf32>
    %52 = vector.broadcast %51 : vector<4x1xf32> to vector<4x256xf32>
    %53 = arith.addf %50, %52 : vector<4x256xf32>
    %c0_26 = arith.constant 0 : index
    %c0_27 = arith.constant 0 : index
    %c0_28 = arith.constant 0 : index
    %54 = vector.load %arg7[%c0_26, %c0_27, %c0_28] : memref<1x4x256xf32, #tpu.memory_space<vmem>>, vector<1x4x256xf32>
    %55 = vector.shape_cast %54 : vector<1x4x256xf32> to vector<4x256xf32>
    %56 = vector.shape_cast %53 : vector<4x256xf32> to vector<1x4x256xf32>
    tpu.vector_store %arg7[%c0_26, %c0_27, %c0_28], %56 {strides = array<i32>} : memref<1x4x256xf32, #tpu.memory_space<vmem>>, vector<1x4x256xf32>,
    return
  }
  func.func @transform_0(%arg0: i32, %arg1: i32) -> (i32, i32, i32) {
    %c0_i32 = arith.constant 0 : i32
    %c0_i32_0 = arith.constant 0 : i32
    return %arg0, %c0_i32, %arg1 : i32, i32, i32
  }
  func.func @transform_1(%arg0: i32, %arg1: i32) -> (i32, i32) {
    %c0_i32 = arith.constant 0 : i32
    %c0_i32_0 = arith.constant 0 : i32
    %c0_i32_1 = arith.constant 0 : i32
    return %c0_i32, %c0_i32_0 : i32, i32
  }
  func.func @transform_2(%arg0: i32, %arg1: i32) -> (i32, i32) {
    %c0_i32 = arith.constant 0 : i32
    %c0_i32_0 = arith.constant 0 : i32
    %c0_i32_1 = arith.constant 0 : i32
    return %c0_i32, %c0_i32_0 : i32, i32
  }
  func.func @transform_3(%arg0: i32, %arg1: i32) -> (i32, i32) {
    %c0_i32 = arith.constant 0 : i32
    %c0_i32_0 = arith.constant 0 : i32
    %c0_i32_1 = arith.constant 0 : i32
    return %c0_i32, %c0_i32_0 : i32, i32
  }
  func.func @transform_4(%arg0: i32, %arg1: i32) -> (i32, i32) {
    %c0_i32 = arith.constant 0 : i32
    %c0_i32_0 = arith.constant 0 : i32
    %c0_i32_1 = arith.constant 0 : i32
    return %c0_i32, %c0_i32_0 : i32, i32
  }
  func.func @transform_5(%arg0: i32, %arg1: i32) -> (i32, i32, i32) {
    %c0_i32 = arith.constant 0 : i32
    %c0_i32_0 = arith.constant 0 : i32
    return %arg0, %c0_i32, %arg1 : i32, i32, i32
  }
}

</mosaic_0001>

<bundles_post_ra>
// kernel: tpu_custom_call.1
= control target key start
LH: loop header
LB: loop body
LE: loop exit
PB: predicated region body
PF: predicated region fallthrough
CT: control target
= control target key end

     0   :  { %10 = vsyncpa [#allocation3], 0  ;;  %s1211_s0 = inlined_call_operand.vmem [shape: f32[2,4,256], index: 0, kind: input, shape index: {}]   ;;  %s1212_s1 = inlined_call_operand.vmem [shape: bf16[32,4], index: 1, kind: input, shape index: {}]   ;;  %s1213_s2 = inlined_call_operand.vmem [shape: f32[32,1], index: 2, kind: input, shape index: {}]   ;;  %s1214_s3 = inlined_call_operand.vmem [shape: bf16[4,32], index: 3, kind: input, shape index: {}]   ;;  %s1215_s4 = inlined_call_operand.vmem [shape: f32[4,1], index: 4, kind: input, shape index: {}]   ;;  %s1216_s5 = inlined_call_operand.hbm [shape: f32[2,4,256], index: 5, kind: output, shape index: {}]  }
   0x1   :  { %12 = vsyncpa [#allocation3 + $0x1], 0  ;;  %s954_s18 = smov 0   ;;  %s956_s19 = smov 0  }
   0x2   :  { %s958_s20 = smov 0   ;;  %s960_s21 = smov 0  }
   0x3   :  { %s962_s22 = smov 0   ;;  %s964_s23 = smov 0  }
   0x4 LB: > { %s728_s24 = sadd.s32 4294967295, %s919_s23   ;;  %s729_s25 = sadd.s32 4294967294, %s919_s23   ;;  %s919_s23 = sphi %s964_s23, %s18_s23   ;;  %s915_s22 = sphi %s962_s22, %s1223_s22   ;;  %s911_s21 = sphi %s960_s21, %s1222_s21   ;;  %s907_s20 = sphi %s958_s20, %s1221_s20   ;;  %s903_s19 = sphi %s956_s19, %s1220_s19   ;;  %s899_s18 = sphi %s954_s18, %s1219_s18  }
   0x5   : > { %s30_s26 = sadd.s32 1, %s915_s22  ;;  %s151_s27 = sadd.s32 1, %s907_s20 }
   0x6   : > { %p32_p0 = scmp.ge.s32.totalorder %s30_s26, 2  ;;  %p161_p1 = scmp.ne.s32.totalorder %s907_s20, %s903_s19 }
   0x7   : > { %p162_p2 = scmp.eq.s32.totalorder %s728_s24, 1  ;;  %p167_p3 = scmp.ne.s32.totalorder %s903_s19, %s899_s18 }
   0x8   : > { %s1225_s26 = smov (%p32_p0, %s30_s26), 0  ;;  %p168_p5 = scmp.eq.s32.totalorder %s729_s25, 1 }
   0x9   : > { %p994_p4 = por %p162_p2, %p161_p1  ;;  %s146_s29 = ssub.s32 %s915_s22, %s1225_s26 }
   0xa   : > { %p732_p6 = scmp.ge.s32.totalorder %s919_s23, 1  ;;  %p149_p7 = scmp.eq.s32.totalorder %s146_s29, 0 }
   0xb   : > { %p1001_p8 = por %p168_p5, %p167_p3  ;;  %p211_p9 = scmp.lt.s32.totalorder %s919_s23, 3 }
   0xc   : > { %s1007_s6 = scalar_select %p149_p7, %s907_s20, %s151_s27  }
   0xd   : > { %p212_p10 = pnand %p732_p6, %p211_p9 }
   0xe   : > { %p244_p11 = scmp.lt.s32.totalorder (!%p212_p10), %s911_s21, 1  ;;  %s240_s13 = sand.u32 (!%p212_p10), 1, %s903_s19  }
   0xf   : > { %215 = sbr.rel (%p212_p10) target bundleno = 515 (0x203), region = 40  ;;  %s733_s14 = sshll.u32 (!%p212_p10), %s240_s13, 3 }
  0x10   : > { %s748_s15 = sshll.u32 (!%p212_p10), %s911_s21, 7  ;;  %s242_s16 = scalar_lea.vmem (!%p212_p10), [#allocation2], %s733_s14 }
  0x11   : > { %s652_s17 = sshll.u32 (!%p212_p10), %s242_s16, 4  ;;  %s1171_s27 = scalar_lea.hbm (!%p212_p10), %s1216_s5, %s748_s15  ;;  %s653_s17 = int_to_ptr.vmem [resolvable:$true] %s652_s17 }
  0x12   : > { %s636_s29 = scalar_lea.sflag (!%p212_p10), [#allocation3], %s240_s13 }
  0x14   : > { %v921_v0 = vmov 0   ;;  %s245_s7 = scalar_select %p244_p11, %s911_s21, 1  ;;  %v265_v1 = vld [vmem:[%s1213_s2] sm:$0xff]  ;;  %v267_v2 = vld [vmem:[%s1213_s2 + $0x10] sm:$0xff]  ;;  %v266_v3 = vld [vmem:[%s1213_s2 + $0x8] sm:$0xff]  ;;  %vm306_vm0 = vcmask 1041408  }
  0x15   : > { %345 = vmatprep.mubr.bf16.mxu0 %v921_v0  ;;  %807 = vset.pattern.permute.xlu1 %v921_v0  ;;  %v268_v4 = vld [vmem:[%s1213_s2 + $0x18] sm:$0xff]  ;;  %v579_v8 = vld [vmem:[%s1215_s4] sm:$0xf]  ;;  %vm299_vm1 = vcmask 31744   ;;  %v810_v12 = vld [vmem:[%s1212_s1 + $0x8] sm:$0xff]   ;;  %vm585_vm10 = vcmask 261120  }
  0x16   : > { %806 = vset.pattern.permute.xlu0 %v921_v0  ;;  %621 = vmatprep.mubr.bf16.mxu1 %v921_v0  ;;  %s747_s12 = sshll.u32 %s245_s7, 3  ;;  %v809_v11 = vld [vmem:[%s1212_s1] sm:$0xff]   ;;  %s843_s7 = scalar_lea.vmem %s653_s17, 128 }
  0x17   : > { %271 = vperm.xlu1 %807, %v265_v1   ;;  %281 = vperm.xlu0 %806, %v267_v2   ;;  %s251_s25 = scalar_lea.vmem %s1211_s0, %s747_s12  ;;  %p844_p12 = scmp.ne.s32.totalorder %s653_s17, %s843_s7 }
  0x18   : > { %v255_v5 = vld [vmem:[%s251_s25] sm:$0xff]  ;;  %s923_s21 = smov [#allocation2]  }
  0x19   : > { %v257_v6 = vcombine.high %v255_v5, %v255_v5  ;;  %v259_v7 = vpack.c.bf16 %v255_v5, %v255_v5  ;;  %p845_p13 = pnand %p844_p12, %p994_p4  ;;  %s847_s8 = sshll.u32 %s923_s21, 4  ;;  %s848_s8 = int_to_ptr.vmem [resolvable:$false] %s847_s8 }
  0x1a   : > { %s849_s9 = scalar_lea.vmem %s848_s8, 256  ;;  %p850_p1 = scmp.lt.s32.totalorder %s653_s17, %s848_s8 }
  0x1b   : > { %276 = vperm.xlu1 %807, %v266_v3   ;;  %286 = vperm.xlu0 %806, %v268_v4   ;;  %v260_v9 = vpack.c.bf16 %v257_v6, %v257_v6  ;;  %v308_v10 = vsel %vm306_vm0, %v259_v7, 0  ;;  %p846_p0 = pneg %p845_p13  ;;  %p851_p2 = scmp.lt.s32.totalorder %s849_s9, %s843_s7 }
  0x1d   : > { %738 = vmatprep.subr.msk.bf16.mxu0 %vm306_vm0, %v260_v9  ;;  %p852_p3 = por %p851_p2, %p850_p1 }
  0x1e   : > { %328 = vmatpush1.bf16.msra.mxu0 %v308_v10 }
  0x1f   : > { %582 = vperm.xlu0 %806, %v579_v8   ;;  %p853_p5 = pnand %p852_p3, %p846_p0 }
  0x21   : > { %739 = vmatmul.mubr.msk.bf16.vlgmr.msra.gmra.mxu0 %vm299_vm1, %v809_v11 }
  0x22   : > { %355 = vmatprep.mubr.bf16.mxu0 %v921_v0 }
  0x29   : > { %740 = vmatmul.mubr.msk.bf16.gmra.mxu0 %vm299_vm1, %v810_v12 }
  0x92   : > { %v272_v13 = vpop.permute.xlu1 %271  ;;  %v282_v35 = vpop.permute.xlu0 %281 }
  0x96   : > { %v277_v19 = vpop.permute.xlu1 %276  ;;  %v287_v45 = vpop.permute.xlu0 %286 }
  0xe1   : > { %v347_v14 = vpop.f32.mrf.mxu0 }
  0xe2   : > { %v1035_v15 = vadd.f32 %v347_v14, %v272_v13 }
  0xe3   : > { %v349_v16 = vpop.f32.mrf.mxu0 }
  0xe4   : > { %v1038_v17 = vmul.f32 0.70710677, %v1035_v15  ;;  %v1040_v18 = vadd.f32 %v349_v16, %v272_v13 }
  0xe5   : > { %v351_v20 = vpop.f32.mrf.mxu0 }
  0xe6   : > { %v398_v21 = vand.u32 2147483647, %v1038_v17  ;;  %v1044_v22 = vmul.f32 0.70710677, %v1040_v18  ;;  %v1046_v23 = vadd.f32 %v351_v20, %v277_v19  ;;  %vm382_vm3 = vcmp.ge.f32.partialorder %v1038_v17, 0.0 }
  0xe7   : > { %v353_v24 = vpop.f32.mrf.mxu0 }
  0xe8   : > { %v406_v25 = vmul.f32 0.3275911, %v398_v21  ;;  %v399_v26 = vand.u32 2147483647, %v1044_v22  ;;  %v1050_v27 = vmul.f32 0.70710677, %v1046_v23  ;;  %v1052_v28 = vadd.f32 %v353_v24, %v277_v19 }
  0xe9   : > { %v357_v29 = vpop.f32.mrf.mxu0  ;;  %v502_v55 = vsub.f32 0.0, %v398_v21  ;;  %vm383_vm2 = vcmp.ge.f32.partialorder %v1044_v22, 0.0 }
  0xea   : > { %v414_v30 = vadd.f32 1.0, %v406_v25  ;;  %v407_v31 = vmul.f32 0.3275911, %v399_v26  ;;  %v400_v32 = vand.u32 2147483647, %v1050_v27  ;;  %v1059_v40 = vadd.f32 %v357_v29, %v282_v35 }
  0xeb   : > { %v1056_v33 = vmul.f32 0.70710677, %v1052_v28  ;;  %v359_v34 = vpop.f32.mrf.mxu0  ;;  %v503_v63 = vsub.f32 0.0, %v399_v26  ;;  %v510_v1 = vmul.f32 %v502_v55, %v398_v21  ;;  %vm384_vm4 = vcmp.ge.f32.partialorder %v1050_v27, 0.0 }
  0xec   : > { %811 = vrcp.f32 %v414_v30  ;;  %v415_v36 = vadd.f32 1.0, %v407_v31  ;;  %v408_v37 = vmul.f32 0.3275911, %v400_v32  ;;  %v1061_v43 = vadd.f32 %v359_v34, %v282_v35 }
  0xed   : > { %v401_v38 = vand.u32 2147483647, %v1056_v33  ;;  %v361_v41 = vpop.f32.mrf.mxu0  ;;  %v1064_v44 = vmul.f32 0.70710677, %v1059_v40  ;;  %v504_v4 = vsub.f32 0.0, %v400_v32  ;;  %v511_v11 = vmul.f32 %v503_v63, %v399_v26 }
  0xee   : > { %813 = vrcp.f32 %v415_v36  ;;  %v416_v39 = vadd.f32 1.0, %v408_v37  ;;  %v1067_v47 = vmul.f32 0.70710677, %v1061_v43  ;;  %v1070_v49 = vadd.f32 %v361_v41, %v287_v45 }
  0xef   : > { %v409_v42 = vmul.f32 0.3275911, %v401_v38  ;;  %v402_v48 = vand.u32 2147483647, %v1064_v44  ;;  %v363_v50 = vpop.f32.mrf.mxu0  ;;  %v505_v5 = vsub.f32 0.0, %v401_v38  ;;  %v512_v19 = vmul.f32 %v504_v4, %v400_v32 }
  0xf0   : > { %815 = vrcp.f32 %v416_v39  ;;  %v403_v52 = vand.u32 2147483647, %v1067_v47  ;;  %v1074_v53 = vmul.f32 0.70710677, %v1070_v49  ;;  %v1076_v54 = vadd.f32 %v363_v50, %v287_v45 }
  0xf1   : > { %v417_v46 = vadd.f32 1.0, %v409_v42  ;;  %v410_v51 = vmul.f32 0.3275911, %v402_v48  ;;  %v518_v16 = vmul.f32 1.442695, %v510_v1  ;;  %v513_v20 = vmul.f32 %v505_v5, %v401_v38 }
  0xf2   : > { %v411_v57 = vmul.f32 0.3275911, %v403_v52  ;;  %v404_v58 = vand.u32 2147483647, %v1074_v53  ;;  %v1080_v59 = vmul.f32 0.70710677, %v1076_v54 }
  0xf3   : > { %817 = vrcp.f32 %v417_v46  ;;  %v418_v56 = vadd.f32 1.0, %v410_v51  ;;  %v506_v21 = vsub.f32 0.0, %v402_v48  ;;  %v507_v30 = vsub.f32 0.0, %v403_v52 }
  0xf4   : > { %v419_v61 = vadd.f32 1.0, %v411_v57  ;;  %v412_v0 = vmul.f32 0.3275911, %v404_v58  ;;  %v405_v2 = vand.u32 2147483647, %v1080_v59  ;;  %v508_v35 = vsub.f32 0.0, %v404_v58 }
  0xf5   : > { %819 = vrcp.f32 %v418_v56  ;;  %v520_v34 = vmul.f32 1.442695, %v511_v11  ;;  %v522_v39 = vmul.f32 1.442695, %v512_v19  ;;  %v514_v38 = vmul.f32 %v506_v21, %v402_v48 }
  0xf6   : > { %821 = vrcp.f32 %v419_v61  ;;  %v420_v6 = vadd.f32 1.0, %v412_v0  ;;  %v413_v8 = vmul.f32 0.3275911, %v405_v2  ;;  %v524_v42 = vmul.f32 1.442695, %v513_v20 }
  0xf7   : > { %v515_v45 = vmul.f32 %v507_v30, %v403_v52  ;;  %v516_v55 = vmul.f32 %v508_v35, %v404_v58  ;;  %v509_v61 = vsub.f32 0.0, %v405_v2  ;;  %v526_v63 = vmul.f32 1.442695, %v514_v38 }
  0xf8   : > { %823 = vrcp.f32 %v420_v6  ;;  %v421_v14 = vadd.f32 1.0, %v413_v8  ;;  %vm385_vm5 = vcmp.ge.f32.partialorder %v1056_v33, 0.0  ;;  %vm386_vm6 = vcmp.ge.f32.partialorder %v1064_v44, 0.0 }
  0xf9   : > { %v1082_v60 = vpop.eup %811  ;;  %v528_v52 = vmul.f32 1.442695, %v515_v45  ;;  %v530_v58 = vmul.f32 1.442695, %v516_v55  ;;  %v517_v11 = vmul.f32 %v509_v61, %v405_v2  ;;  %vm387_vm7 = vcmp.ge.f32.partialorder %v1067_v47, 0.0 }
  0xfa   : > { %v430_v62 = vmul.f32 1.0614054, %v1082_v60  ;;  %825 = vrcp.f32 %v421_v14  ;;  %vm388_vm8 = vcmp.ge.f32.partialorder %v1074_v53, 0.0  ;;  %vm389_vm9 = vcmp.ge.f32.partialorder %v1080_v59, 0.0 }
  0xfb   : > { %v1086_v3 = vpop.eup %813  ;;  %827 = vpow2.f32 %v518_v16  ;;  %v532_v2 = vmul.f32 1.442695, %v517_v11  ;;  %v369_v22 = vmul.f32 0.5, %v1052_v28  ;;  %v371_v27 = vmul.f32 0.5, %v1061_v43 }
  0xfc   : > { %v431_v7 = vmul.f32 1.0614054, %v1086_v3  ;;  %v438_v10 = vadd.f32 -1.4531521, %v430_v62  ;;  %829 = vpow2.f32 %v520_v34  ;;  %v368_v28 = vmul.f32 0.5, %v1046_v23 }
  0xfd   : > { %v1089_v9 = vpop.eup %815  ;;  %831 = vpow2.f32 %v522_v39  ;;  %v366_v43 = vmul.f32 0.5, %v1035_v15  ;;  %v578_v23 = vld [vmem:[%s1214_s3] sm:$0x3]  ;;  %v583_v15 = vpop.permute.xlu0 %582 }
  0xfe   : > { %v439_v12 = vadd.f32 -1.4531521, %v431_v7  ;;  %v432_v13 = vmul.f32 1.0614054, %v1089_v9  ;;  %v446_v31 = vmul.f32 %v1082_v60, %v438_v10  ;;  %833 = vpow2.f32 %v524_v42 }
  0xff   : > { %835 = vpow2.f32 %v526_v63 }
 0x100   : > { %v1092_v24 = vpop.eup %817  ;;  %v447_v25 = vmul.f32 %v1086_v3, %v439_v12  ;;  %v440_v29 = vadd.f32 -1.4531521, %v432_v13  ;;  %v454_v50 = vadd.f32 1.4214138, %v446_v31  ;;  %837 = vpow2.f32 %v528_v52 }
 0x101   : > { %v433_v26 = vmul.f32 1.0614054, %v1092_v24  ;;  %839 = vpow2.f32 %v530_v58 }
 0x102   : > { %v455_v36 = vadd.f32 1.4214138, %v447_v25  ;;  %v448_v37 = vmul.f32 %v1089_v9, %v440_v29  ;;  %v1098_v46 = vpop.eup %819  ;;  %v462_v4 = vmul.f32 %v1082_v60, %v454_v50  ;;  %841 = vpow2.f32 %v532_v2 }
 0x103   : > { %v441_v32 = vadd.f32 -1.4531521, %v433_v26  ;;  %v434_v62 = vmul.f32 1.0614054, %v1098_v46  ;;  %v1104_v0 = vpop.eup %821 }
 0x104   : > { %v456_v41 = vadd.f32 1.4214138, %v448_v37  ;;  %v463_v56 = vmul.f32 %v1086_v3, %v455_v36  ;;  %v435_v6 = vmul.f32 1.0614054, %v1104_v0  ;;  %v470_v21 = vadd.f32 -0.28449672, %v462_v4 }
 0x105   : > { %v449_v51 = vmul.f32 %v1092_v24, %v441_v32  ;;  %v442_v1 = vadd.f32 -1.4531521, %v434_v62  ;;  %v1109_v7 = vpop.eup %823 }
 0x106   : > { %v464_v57 = vmul.f32 %v1089_v9, %v456_v41  ;;  %v471_v8 = vadd.f32 -0.28449672, %v463_v56  ;;  %v443_v14 = vadd.f32 -1.4531521, %v435_v6  ;;  %v436_v16 = vmul.f32 1.0614054, %v1109_v7 }
 0x107   : > { %v457_v48 = vadd.f32 1.4214138, %v449_v51  ;;  %v450_v12 = vmul.f32 %v1098_v46, %v442_v1  ;;  %v1113_v20 = vpop.eup %825  ;;  %v478_v42 = vmul.f32 %v1082_v60, %v470_v21 }
 0x108   : > { %v472_v10 = vadd.f32 -0.28449672, %v464_v57  ;;  %v451_v29 = vmul.f32 %v1104_v0, %v443_v14  ;;  %v444_v30 = vadd.f32 -1.4531521, %v436_v16  ;;  %v479_v31 = vmul.f32 %v1086_v3, %v471_v8  ;;  %v828_v41 = vpop.eup %827 }
 0x109   : > { %v465_v5 = vmul.f32 %v1092_v24, %v457_v48  ;;  %v458_v19 = vadd.f32 1.4214138, %v450_v12  ;;  %v437_v34 = vmul.f32 1.0614054, %v1113_v20  ;;  %v830_v51 = vpop.eup %829  ;;  %v486_v58 = vadd.f32 0.2548296, %v478_v42 }
 0x10a   : > { %v480_v35 = vmul.f32 %v1089_v9, %v472_v10  ;;  %v459_v36 = vadd.f32 1.4214138, %v451_v29  ;;  %v452_v37 = vmul.f32 %v1109_v7, %v444_v30  ;;  %v487_v55 = vadd.f32 0.2548296, %v479_v31  ;;  %v832_v63 = vpop.eup %831 }
 0x10b   : > { %v473_v13 = vadd.f32 -0.28449672, %v465_v5  ;;  %v466_v26 = vmul.f32 %v1098_v46, %v458_v19  ;;  %v445_v32 = vadd.f32 -1.4531521, %v437_v34  ;;  %v834_v5 = vpop.eup %833  ;;  %v494_v29 = vmul.f32 %v1082_v60, %v486_v58 }
 0x10c   : > { %v467_v45 = vmul.f32 %v1104_v0, %v459_v36  ;;  %v460_v50 = vadd.f32 1.4214138, %v452_v37  ;;  %v488_v61 = vadd.f32 0.2548296, %v480_v35  ;;  %v495_v10 = vmul.f32 %v1086_v3, %v487_v55  ;;  %v836_v19 = vpop.eup %835 }
 0x10d   : > { %v481_v25 = vmul.f32 %v1092_v24, %v473_v13  ;;  %v474_v38 = vadd.f32 -0.28449672, %v466_v26  ;;  %v453_v56 = vmul.f32 %v1113_v20, %v445_v32  ;;  %v922_v42 = vmov -1.0  }
 0x10e   : > { %v475_v62 = vadd.f32 -0.28449672, %v467_v45  ;;  %v468_v48 = vmul.f32 %v1109_v7, %v460_v50  ;;  %v496_v13 = vmul.f32 %v1089_v9, %v488_v61  ;;  %v393_v45 = vsel %vm385_vm5, 1.0, %v922_v42 }
 0x10f   : > { %v489_v39 = vadd.f32 0.2548296, %v481_v25  ;;  %v482_v57 = vmul.f32 %v1098_v46, %v474_v38  ;;  %v461_v1 = vadd.f32 1.4214138, %v453_v56  ;;  %v838_v25 = vpop.eup %837  ;;  %v394_v44 = vsel %vm386_vm6, 1.0, %v922_v42 }
 0x110   : > { %v483_v6 = vmul.f32 %v1104_v0, %v475_v62  ;;  %v476_v8 = vadd.f32 -0.28449672, %v468_v48  ;;  %v536_v2 = vmul.f32 %v832_v63, %v496_v13  ;;  %v840_v35 = vpop.eup %839  ;;  %v396_v55 = vsel %vm388_vm8, 1.0, %v922_v42 }
 0x111   : > { %v497_v52 = vmul.f32 %v1092_v24, %v489_v39  ;;  %v490_v4 = vadd.f32 0.2548296, %v482_v57  ;;  %v469_v11 = vmul.f32 %v1113_v20, %v461_v1  ;;  %v395_v56 = vsel %vm387_vm7, 1.0, %v922_v42 }
 0x112   : > { %v491_v14 = vadd.f32 0.2548296, %v483_v6  ;;  %v484_v16 = vmul.f32 %v1109_v7, %v476_v8  ;;  %v391_v62 = vsel %vm383_vm2, 1.0, %v922_v42  ;;  %v390_v58 = vsel %vm382_vm3, 1.0, %v922_v42 }
 0x113   : > { %v498_v12 = vmul.f32 %v1098_v46, %v490_v4  ;;  %v537_v24 = vmul.f32 %v834_v5, %v497_v52  ;;  %v477_v21 = vadd.f32 -0.28449672, %v469_v11  ;;  %v535_v46 = vmul.f32 %v830_v51, %v495_v10 }
 0x114   : > { %v499_v3 = vmul.f32 %v1104_v0, %v491_v14  ;;  %v492_v30 = vadd.f32 0.2548296, %v484_v16  ;;  %v534_v0 = vmul.f32 %v828_v41, %v494_v29  ;;  %v544_v51 = vsub.f32 1.0, %v536_v2 }
 0x115   : > { %v538_v31 = vmul.f32 %v836_v19, %v498_v12  ;;  %v485_v9 = vmul.f32 %v1113_v20, %v477_v21  ;;  %v545_v36 = vsub.f32 1.0, %v537_v24  ;;  %v543_v38 = vsub.f32 1.0, %v535_v46 }
 0x116   : > { %v539_v34 = vmul.f32 %v838_v25, %v499_v3  ;;  %v500_v26 = vmul.f32 %v1109_v7, %v492_v30  ;;  %v842_v7 = vpop.eup %841  ;;  %v542_v61 = vsub.f32 1.0, %v534_v0  ;;  %v397_v4 = vsel %vm389_vm9, 1.0, %v922_v42 }
 0x117   : > { %v493_v60 = vadd.f32 0.2548296, %v485_v9  ;;  %v546_v32 = vsub.f32 1.0, %v538_v31  ;;  %v553_v57 = vmul.f32 %v545_v36, %v393_v45  ;;  %v551_v63 = vmul.f32 %v543_v38, %v391_v62 }
 0x118   : > { %v547_v37 = vsub.f32 1.0, %v539_v34  ;;  %v540_v39 = vmul.f32 %v840_v35, %v500_v26  ;;  %v550_v10 = vmul.f32 %v542_v61, %v390_v58  ;;  %v372_v11 = vmul.f32 0.5, %v1070_v49 }
 0x119   : > { %v501_v50 = vmul.f32 %v1113_v20, %v493_v60  ;;  %v554_v48 = vmul.f32 %v546_v32, %v394_v44  ;;  %v392_v20 = vsel %vm384_vm4, 1.0, %v922_v42  ;;  %v561_v59 = vadd.f32 1.0, %v553_v57 }
 0x11a   : > { %v548_v47 = vsub.f32 1.0, %v540_v39  ;;  %v555_v41 = vmul.f32 %v547_v37, %v395_v56  ;;  %v552_v1 = vmul.f32 %v544_v51, %v392_v20  ;;  %v559_v13 = vadd.f32 1.0, %v551_v63 }
 0x11b   : > { %v541_v53 = vmul.f32 %v842_v7, %v501_v50  ;;  %v562_v12 = vadd.f32 1.0, %v554_v48  ;;  %v373_v14 = vmul.f32 0.5, %v1076_v54  ;;  %v370_v24 = vmul.f32 0.5, %v1059_v40 }
 0x11c   : > { %v556_v33 = vmul.f32 %v548_v47, %v396_v55  ;;  %v563_v8 = vadd.f32 1.0, %v555_v41  ;;  %v560_v19 = vadd.f32 1.0, %v552_v1  ;;  %v367_v21 = vmul.f32 0.5, %v1040_v18 }
 0x11d   : > { %v549_v52 = vsub.f32 1.0, %v541_v53  ;;  %v569_v25 = vmul.f32 %v561_v59, %v369_v22  ;;  %v558_v30 = vadd.f32 1.0, %v550_v10  ;;  %v570_v49 = vmul.f32 %v562_v12, %v370_v24 }
 0x11e   : > { %v564_v5 = vadd.f32 1.0, %v556_v33  ;;  %v571_v29 = vmul.f32 %v563_v8, %v371_v27  ;;  %v567_v31 = vmul.f32 %v559_v13, %v367_v21  ;;  %v568_v54 = vmul.f32 %v560_v19, %v368_v28 }
 0x11f   : > { %v557_v6 = vmul.f32 %v549_v52, %v397_v4  ;;  %v566_v2 = vmul.f32 %v558_v30, %v366_v43 }
 0x120   : > { %v572_v17 = vmul.f32 %v564_v5, %v372_v11  ;;  %v575_v40 = vpack.c.bf16 %v569_v25, %v567_v31 }
 0x121   : > { %v565_v16 = vadd.f32 1.0, %v557_v6  ;;  %v574_v18 = vpack.c.bf16 %v568_v54, %v566_v2 }
 0x122   : > { %v576_v9 = vpack.c.bf16 %v572_v17, %v570_v49 }
 0x123   : > { %v573_v3 = vmul.f32 %v565_v16, %v373_v14 }
 0x125   : > { %v577_v46 = vpack.c.bf16 %v573_v3, %v571_v29 }
 0x127   : > { %601 = vmatprep.subr.bf16.mxu1 %v577_v46 }
 0x128   : > { %602 = vmatpush1.bf16.msra.mxu1 %v576_v9 }
 0x129   : > { %603 = vmatprep.subr.bf16.mxu1 %v575_v40 }
 0x12c   : > { %604 = vmatpush1.bf16.msra.mxu1 %v574_v18 }
 0x12f   : > { %741 = vmatmul.mubr.msk.bf16.vlgmr.msra.gmra.mxu1 %vm585_vm10, %v578_v23 }
 0x1ef   : > { %v623_v34 = vpop.f32.mrf.mxu1 }
 0x1f0   : > { %v624_v35 = vadd.f32 %v623_v34, %v583_v15 }
 0x1f1   : > { %v625_v26 = vpop.f32.mrf.mxu1 }
 0x1f2   : > { %v626_v36 = vadd.f32 %v625_v26, %v583_v15 }
 0x1f3   : > { %v627_v60 = vpop.f32.mrf.mxu1 }
 0x1f4   : > { %v632_v0 = vcombine.low %v624_v35, %v626_v36 }
 0x1f5   : > { %v628_v37 = vpop.f32.mrf.mxu1 }
 0x1f6   : > { %634 = vst [vmem:[%s242_s16] sm:$0xff] %v632_v0 }
 0x1f7   : > { %856 = shalt.err (!%p853_p5)
}
 0x1f8   : > { %s857_s10 = scalar_lea.hbm %s1171_s27, 128  ;;  %s861_s13 = scalar_lea.hbm %s1216_s5, 256 }
 0x1f9   : > { %p858_p6 = scmp.ne.s32.totalorder %s1171_s27, %s857_s10  ;;  %p862_p10 = scmp.lt.s32.totalorder %s1171_s27, %s1216_s5 }
 0x1fa   : > { %p863_p11 = scmp.lt.s32.totalorder %s861_s13, %s857_s10 }
 0x1fb   : > { %p859_p7 = pnand %p858_p6, %p994_p4 }
 0x1fc   : > { %p864_p12 = por %p863_p11, %p862_p10 }
 0x1fd   : > { %p860_p9 = pneg %p859_p7 }
 0x1ff   : > { %p865_p13 = pnand %p864_p12, %p860_p9 }
 0x201   : > { %868 = shalt.err (!%p865_p13)
}
 0x202   : > { %749 = dma.vmem_to_hbm [thread:$0]  (%p994_p4), %s653_s17, 128, %s1171_s27, %s636_s29  }
 0x203 PF: > { %p755_p0 = scmp.ge.s32.totalorder %s919_s23, 2  ;;  %s664_s16 = sand.u32 1, %s899_s18  }
 0x204   : > { %s665_s24 = scalar_lea.sflag [#allocation3], %s664_s16 }
 0x205   : > { %p752_p1 = pnand %p755_p0, %p1001_p8 }
 0x207   : > { %p753_p2 = pneg %p752_p1 }
 0x209   : > { %894 = dma.done.wait (%p753_p2), %s665_s24, 128  }
 0x20a   : > { %896 = vsyncadd (%p753_p2), %s665_s24, 4294967168  ;;  %s18_s23 = sadd.s32 1, %s919_s23   ;;  %s1219_s18 = smov %s903_s19 }
 0x20b   : > { %p15_p3 = scmp.ge.s32.totalorder %s18_s23, 4   ;;  %s1220_s19 = smov %s907_s20 }
 0x20c   : > { %s1221_s20 = smov %s1007_s6  ;;  %s1222_s21 = smov %s915_s22 }
 0x20d   : > { %s1223_s22 = smov %s1225_s26  ;;  %17 = sbr.rel (!%p15_p3) target bundleno = 4 (0x4), region = 75 }
 0x212   :  { %670 = vsyncpa [#allocation3], 1 }
 0x213   :  { %672 = vsyncpa [#allocation3 + $0x1], 1 }

</bundles_post_ra>
